<compile_context>
chip_gen: v7x
topology: tpu7x:2x2x1
jax: 0.10.0
libtpu: 0.0.40
codegen_flags: <defaults>
</compile_context>

<pallas_src>
import functools

import jax
import jax.numpy as jnp
from jax import lax
from jax.experimental import pallas as pl
from jax.experimental.pallas import tpu as pltpu

EPS = 1e-5
CP = 128                         # padded (lane-dense) channel width
# TODO(synk): tune per generation: ~96-100 MiB on v5e/v6e, <=56 MiB on v7x (64 MiB/TC).
VMEM_LIMIT = 48 * 1024 * 1024


# ----------------------------------------------------------------------------- kernels

def stats1_kernel(xr_ref, gram_ref, csum_ref):
    """Accumulate column-sum and Gram of the lane-dense (M/group, 128) view of x.

    BN1 statistics of the *linear* 1x1 conv follow from these in O(C) glue:
      sum(t)   = colsum(x) @ w1
      sum(t^2) = diag(w1^T (x^T x) w1)
    """
    @pl.when(pl.program_id(0) == 0)
    def _():
        gram_ref[...] = jnp.zeros_like(gram_ref)
        csum_ref[...] = jnp.zeros_like(csum_ref)

    xr = xr_ref[...]
    gram_ref[...] += lax.dot_general(
        xr, xr, (((0,), (0,)), ((), ())), preferred_element_type=jnp.float32)
    csum_ref[0:1, :] += jnp.sum(xr, axis=0, keepdims=True)


def mid_kernel(xp_ref, w1b_ref, w2_ref, sb1_ref,
               y2_ref, s2_ref, sbr_ref,
               pp_ref, acc_ref, *, H2, W2):
    """Per batch item: conv1 + BN1 + ReLU, fused 3x3 stride-2 conv (raw, bf16 out),
    plus per-item partial BN statistics for conv2 and the branch conv."""
    MP = H2 * W2
    CPd = w2_ref.shape[-1]
    Wp = pp_ref.shape[2]

    scale1 = sb1_ref[0:1, :]
    bias1 = sb1_ref[1:2, :]

    # Full zero only once (scratch persists across grid steps; the data interior
    # is fully overwritten every step).
    @pl.when(pl.program_id(0) == 0)
    def _():
        pp_ref[...] = jnp.zeros_like(pp_ref)

    # Per step, only the halo cells actually read by the taps need re-zeroing
    # (keeps correctness even if the batch grid is split across TensorCores).
    pp_ref[0, 0:1, :, :] = jnp.zeros((1, Wp, CPd), jnp.float32)
    pp_ref[1, 0:1, :, :] = jnp.zeros((1, Wp, CPd), jnp.float32)
    pp_ref[0, :, 0:1, :] = jnp.zeros((H2 + 1, 1, CPd), jnp.float32)
    pp_ref[2, :, 0:1, :] = jnp.zeros((H2 + 1, 1, CPd), jnp.float32)

    # conv1 (1x1) + BN1 + ReLU per spatial-parity phase of x, scattered with
    # static slices into the zero-padded polyphase buffer.  Phase (0,0) also
    # feeds the branch conv: its matmul is fused with the branch weights
    # (columns [CP:2CP] of w1b) and only its BN statistics are kept.
    for ph in range(2):
        for pw in range(2):
            xc = xp_ref[0, ph * 2 + pw]                       # (MP, Cin)
            if ph == 0 and pw == 0:
                t = jnp.dot(xc, w1b_ref[...], preferred_element_type=jnp.float32)
                t1 = t[:, :CPd]
                br = t[:, CPd:]
                sbr_ref[0] = jnp.concatenate(
                    [jnp.sum(br, axis=0, keepdims=True),
                     jnp.sum(br * br, axis=0, keepdims=True)], axis=0)
            else:
                t1 = jnp.dot(xc, w1b_ref[:, :CPd],
                             preferred_element_type=jnp.float32)
            y1c = jnp.maximum(t1 * scale1 + bias1, 0.0)
            a, u0 = (ph + 1) % 2, (ph + 1) // 2
            b, v0 = (pw + 1) % 2, (pw + 1) // 2
            pp_ref[a * 2 + b, u0:u0 + H2, v0:v0 + W2, :] = y1c.reshape(H2, W2, CPd)

    # 3x3 stride-2 conv (padding=1) as 9 shifted matmuls over the polyphase
    # buffer, accumulated into a VMEM scratch ref (one tap tile live at a time).
    # TODO(synk): on v5e pack the 9 taps' 7 live channels into one K<=128 matmul.
    for dy in range(3):
        for dx in range(3):
            tap = pp_ref[(dy % 2) * 2 + (dx % 2),
                         dy // 2:dy // 2 + H2,
                         dx // 2:dx // 2 + W2, :].reshape(MP, CPd)
            contrib = jnp.dot(tap, w2_ref[dy * 3 + dx],
                              preferred_element_type=jnp.float32)
            if dy == 0 and dx == 0:
                acc_ref[...] = contrib
            else:
                acc_ref[...] += contrib

    acc = acc_ref[...]
    s2_ref[0] = jnp.concatenate(
        [jnp.sum(acc, axis=0, keepdims=True),
         jnp.sum(acc * acc, axis=0, keepdims=True)], axis=0)
    y2_ref[0] = acc.astype(y2_ref.dtype)          # bf16 HBM intermediate


def stats3_kernel(y2_ref, w3_ref, sb2_ref, stats_ref):
    """BN3 batch statistics of conv3(relu(bn2(conv2_raw))), accumulated in-place."""
    @pl.when(pl.program_id(0) == 0)
    def _():
        stats_ref[...] = jnp.zeros_like(stats_ref)

    h = jnp.maximum(y2_ref[...].astype(jnp.float32) * sb2_ref[0:1, :]
                    + sb2_ref[1:2, :], 0.0)
    m = jnp.dot(h, w3_ref[...], preferred_element_type=jnp.float32)
    stats_ref[0:1, :] += jnp.sum(m, axis=0, keepdims=True)
    stats_ref[1:2, :] += jnp.sum(m * m, axis=0, keepdims=True)


def final_kernel(y2_ref, x0_ref, w3_ref, wb_ref, sb_ref, o_ref):
    """BN2+ReLU, conv3, BN3; branch conv recomputed from x phase-0 + BNb;
    residual add + final ReLU."""
    h = jnp.maximum(y2_ref[...].astype(jnp.float32) * sb_ref[0:1, :]
                    + sb_ref[1:2, :], 0.0)
    main = jnp.dot(h, w3_ref[...], preferred_element_type=jnp.float32)
    main = main * sb_ref[2:3, :] + sb_ref[3:4, :]
    br = jnp.dot(x0_ref[...], wb_ref[...], preferred_element_type=jnp.float32)
    br = br * sb_ref[4:5, :] + sb_ref[5:6, :]
    o_ref[...] = jnp.maximum(main + br, 0.0)


# ----------------------------------------------------------------------------- wrapper

def _pick_tile(m, target, align=8):
    """Largest multiple-of-`align` divisor of m that is <= target (>= align).
    Falls back to a single full-size block (m) when no aligned divisor exists;
    callers should keep m reasonable in that case (VMEM)."""
    if m <= align or m % align != 0:
        return m
    t = min(m, max(align, (target // align) * align))
    t -= t % align
    while t >= align:
        if m % t == 0:
            return t
        t -= align
    return m


def _fold_bn(stats, count, g, b):
    # Fold training-mode BN stats into per-channel scale/bias (O(C) glue):
    #   y_norm = (y - mean) * rsqrt(var + eps) * g + b == y * scale + bias
    # NOTE: single-pass E[y^2]-mean^2 variance; fine for activation-scale data.
    mean = stats[0] / count
    var = stats[1] / count - mean * mean
    scale = g * lax.rsqrt(var + EPS)
    bias = b - mean * scale
    return jnp.stack([scale, bias]).astype(jnp.float32)   # (2, CP)


def bottleneck_forward(x, kp, *, row_tile=4096):
    """x: (N, H, W, Cin) float32. Returns (N, H//2, W//2, Cout)."""
    N, H, W, Cin = x.shape
    assert H % 2 == 0 and W % 2 == 0, "even spatial dims required (stride-2 convs)"
    H2, W2 = H // 2, W // 2
    MP = H2 * W2
    M = N * H * W
    MT2 = N * MP
    cout = kp["cout"]

    w1p, w2p, w3p, wbp, w1bp = kp["w1p"], kp["w2p"], kp["w3p"], kp["wbp"], kp["w1bp"]

    cp_arb = pltpu.CompilerParams(dimension_semantics=("arbitrary",),
                                  vmem_limit_bytes=VMEM_LIMIT)
    cp_par = pltpu.CompilerParams(dimension_semantics=("parallel",),
                                  vmem_limit_bytes=VMEM_LIMIT)

    # ---- pass 1: BN1 stats via lane-dense Gram + colsum of x -------------------
    # TODO(synk): general Cin (128 % Cin != 0) needs the old (TM, Cin) fallback.
    assert CP % Cin == 0, "Gram stats path requires Cin to divide 128"
    group = CP // Cin
    Mg = -(-M // group)
    pad_rows = Mg * group - M
    x_flat = x.reshape(M, Cin)
    if pad_rows:
        x_flat = jnp.pad(x_flat, ((0, pad_rows), (0, 0)))   # zero rows: no effect
    xr = x_flat.reshape(Mg, CP)                              # contiguous (free) view
    TG = _pick_tile(Mg, row_tile, 8)
    # TODO(synk): v7x: split this reduction over both TensorCores (2-row grid).
    gram, csum = pl.pallas_call(
        stats1_kernel,
        out_shape=(jax.ShapeDtypeStruct((CP, CP), jnp.float32),
                   jax.ShapeDtypeStruct((8, CP), jnp.float32)),
        grid=(Mg // TG,),
        in_specs=[pl.BlockSpec((TG, CP), lambda i: (i, 0))],
        out_specs=(pl.BlockSpec((CP, CP), lambda i: (0, 0)),
                   pl.BlockSpec((8, CP), lambda i: (0, 0))),
        compiler_params=cp_arb,
    )(xr)
    colsum_x = jnp.sum(csum[0].reshape(group, Cin), axis=0)                   # (Cin,)
    gram_x = jnp.einsum('icid->cd', gram.reshape(group, Cin, group, Cin))     # (Cin,Cin)
    sum1 = colsum_x @ w1p                                                     # (CP,)
    sumsq1 = jnp.einsum('kc,kl,lc->c', w1p, gram_x, w1p)                      # (CP,)
    sb1 = _fold_bn(jnp.stack([sum1, sumsq1]), M, kp["g1"], kp["b1"])

    # ---- glue: polyphase (stride-2 deinterleave) view of x, pre-flattened ------
    # component k = ph*2 + pw  <->  x[:, ph::2, pw::2, :]
    x_poly = (x.reshape(N, H2, 2, W2, 2, Cin)
               .transpose(0, 2, 4, 1, 3, 5)
               .reshape(N, 4, MP, Cin))
    x0flat = x_poly[:, 0].reshape(MT2, Cin)      # branch input (re-read in pass 4)

    # ---- pass 2: conv1+BN1+ReLU, fused 3x3 s2 conv (bf16 out), BN stats --------
    W2pad = ((W2 + 1 + 7) // 8) * 8
    mid = functools.partial(mid_kernel, H2=H2, W2=W2)
    # TODO(synk): pipeline_mode=pl.Buffered(1) on the constant weight specs (v7x VMEM).
    y2raw, s2p, sbp = pl.pallas_call(
        mid,
        out_shape=(jax.ShapeDtypeStruct((N, MP, CP), jnp.bfloat16),
                   jax.ShapeDtypeStruct((N, 2, CP), jnp.float32),
                   jax.ShapeDtypeStruct((N, 2, CP), jnp.float32)),
        grid=(N,),
        in_specs=[pl.BlockSpec((1, 4, MP, Cin), lambda n: (n, 0, 0, 0)),
                  pl.BlockSpec((Cin, 2 * CP), lambda n: (0, 0)),
                  pl.BlockSpec((9, CP, CP), lambda n: (0, 0, 0)),
                  pl.BlockSpec((2, CP), lambda n: (0, 0))],
        out_specs=(pl.BlockSpec((1, MP, CP), lambda n: (n, 0, 0)),
                   pl.BlockSpec((1, 2, CP), lambda n: (n, 0, 0)),
                   pl.BlockSpec((1, 2, CP), lambda n: (n, 0, 0))),
        scratch_shapes=[pltpu.VMEM((4, H2 + 1, W2pad, CP), jnp.float32),
                        pltpu.VMEM((MP, CP), jnp.float32)],
        compiler_params=cp_par,
    )(x_poly, w1bp, w2p, sb1)

    sb2 = _fold_bn(jnp.sum(s2p, axis=0), MT2, kp["g2"], kp["b2"])
    sbb = _fold_bn(jnp.sum(sbp, axis=0), MT2, kp["gb"], kp["bb"])
    y2flat = y2raw.reshape(MT2, CP)

    # ---- pass 3: BN3 batch statistics of the conv3 output ----------------------
    TM2 = _pick_tile(MT2, row_tile, 16)          # 16-aligned for the bf16 blocks
    stats3 = pl.pallas_call(
        stats3_kernel,
        out_shape=jax.ShapeDtypeStruct((2, CP), jnp.float32),
        grid=(MT2 // TM2,),
        in_specs=[pl.BlockSpec((TM2, CP), lambda i: (i, 0)),
                  pl.BlockSpec((CP, CP), lambda i: (0, 0)),
                  pl.BlockSpec((2, CP), lambda i: (0, 0))],
        out_specs=pl.BlockSpec((2, CP), lambda i: (0, 0)),
        compiler_params=cp_arb,
    )(y2flat, w3p, sb2)
    sb3 = _fold_bn(stats3, MT2, kp["g3"], kp["b3"])

    # ---- pass 4: BN2+ReLU, conv3, BN3, branch conv+BN, residual add + ReLU -----
    sball = jnp.concatenate([sb2, sb3, sbb], axis=0)      # (6, CP)
    out = pl.pallas_call(
        final_kernel,
        out_shape=jax.ShapeDtypeStruct((MT2, CP), jnp.float32),
        grid=(MT2 // TM2,),
        in_specs=[pl.BlockSpec((TM2, CP), lambda i: (i, 0)),
                  pl.BlockSpec((TM2, Cin), lambda i: (i, 0)),
                  pl.BlockSpec((CP, CP), lambda i: (0, 0)),
                  pl.BlockSpec((Cin, CP), lambda i: (0, 0)),
                  pl.BlockSpec((6, CP), lambda i: (0, 0))],
        out_specs=pl.BlockSpec((TM2, CP), lambda i: (i, 0)),
        compiler_params=cp_par,
    )(y2flat, x0flat, w3p, wbp, sball)

    # TODO(synk): at production, hand the 128-padded slab to the consumer instead
    # of paying this strided slice as a separate XLA pass.
    return out.reshape(N, H2, W2, CP)[..., :cout]


# ----------------------------------------------------------------------------- params & reference

def init_params(key, cin, cout):
    ks = jax.random.split(key, 8)
    cmid = 7
    w1 = 0.5 * jax.random.normal(ks[0], (1, 1, cin, cmid), jnp.float32)
    w2 = 0.2 * jax.random.normal(ks[1], (3, 3, cmid, cmid), jnp.float32)
    w3 = 0.5 * jax.random.normal(ks[2], (1, 1, cmid, cout), jnp.float32)
    wb = 0.5 * jax.random.normal(ks[3], (1, 1, cin, cout), jnp.float32)

    def bn_affine(k, c):
        kg, kb = jax.random.split(k)
        return (1.0 + 0.1 * jax.random.normal(kg, (c,), jnp.float32),
                0.1 * jax.random.normal(kb, (c,), jnp.float32))

    g1, b1 = bn_affine(ks[4], cmid)
    g2, b2 = bn_affine(ks[5], cmid)
    g3, b3 = bn_affine(ks[6], cout)
    gb, bb = bn_affine(ks[7], cout)

    def padv(v):                       # pad a (c,) vector with zeros to CP
        return jnp.pad(v, ((0, CP - v.shape[0]),))

    w1p = jnp.pad(w1.reshape(cin, cmid), ((0, 0), (0, CP - cmid)))
    wbp = jnp.pad(wb.reshape(cin, cout), ((0, 0), (0, CP - cout)))
    kparams = dict(
        w1p=w1p,
        wbp=wbp,
        w1bp=jnp.concatenate([w1p, wbp], axis=1),            # fused phase-0 weight
        w2p=jnp.pad(w2.reshape(9, cmid, cmid),
                    ((0, 0), (0, CP - cmid), (0, CP - cmid))),
        w3p=jnp.pad(w3.reshape(cmid, cout), ((0, CP - cmid), (0, CP - cout))),
        g1=padv(g1), b1=padv(b1), g2=padv(g2), b2=padv(b2),
        g3=padv(g3), b3=padv(b3), gb=padv(gb), bb=padv(bb),
        cout=cout,
    )
    hwio = (w1, w2, w3, wb)
    affine = (g1, b1, g2, b2, g3, b3, gb, bb)
    return kparams, hwio, affine


def reference_forward(x, hwio, affine):
    """Pure-JAX reference mirroring the PyTorch forward (training-mode BN)."""
    w1, w2, w3, wb = hwio
    g1, b1, g2, b2, g3, b3, gb, bb = affine
    dn = ('NHWC', 'HWIO', 'NHWC')

    def bn(y, g, b):
        mean = jnp.mean(y, axis=(0, 1, 2), keepdims=True)
        var = jnp.mean((y - mean) ** 2, axis=(0, 1, 2), keepdims=True)
        return ((y - mean) * lax.rsqrt(var + EPS) * g.reshape(1, 1, 1, -1)
                + b.reshape(1, 1, 1, -1))

    y = lax.conv_general_dilated(x, w1, (1, 1), 'VALID', dimension_numbers=dn)
    y = jnp.maximum(bn(y, g1, b1), 0.0)
    y = lax.conv_general_dilated(y, w2, (2, 2), ((1, 1), (1, 1)), dimension_numbers=dn)
    y = jnp.maximum(bn(y, g2, b2), 0.0)
    y = lax.conv_general_dilated(y, w3, (1, 1), 'VALID', dimension_numbers=dn)
    main = bn(y, g3, b3)
    br = lax.conv_general_dilated(x, wb, (2, 2), 'VALID', dimension_numbers=dn)
    br = bn(br, gb, bb)
    return jnp.maximum(main + br, 0.0)


# ----------------------------------------------------------------------------- test

if __name__ == "__main__":
    key = jax.random.PRNGKey(0)
    kx, kparam_key = jax.random.split(key)
    N, Cin, H, W, Cout = 2, 4, 16, 16, 8

    # The PyTorch module consumes NCHW; the kernels use NHWC (channels on lanes).
    x_nchw = jax.random.normal(kx, (N, Cin, H, W), jnp.float32)
    x = jnp.transpose(x_nchw, (0, 2, 3, 1))

    kparams, hwio, affine = init_params(kparam_key, Cin, Cout)

    # row_tile=8 forces several grid steps at these tiny test shapes so every
    # cross-tile accumulation path is exercised; production default is 4096.
    out = jax.block_until_ready(bottleneck_forward(x, kparams, row_tile=8))

    ref = reference_forward(x, hwio, affine)
    assert out.shape == (N, H // 2, W // 2, Cout), out.shape
    max_err = float(jnp.max(jnp.abs(out - ref)))
    # bf16 storage of the conv2 intermediate -> looser tolerance than pure f32.
    assert jnp.allclose(out, ref, atol=5e-2, rtol=5e-2), f"max_err={max_err}"
    print("KERNEL_OK")
</pallas_src>

<mosaic_0001>
module attributes {stable_mosaic.version = 11 : i64} {
  func.func @stats1_kernel(%arg0: i32, %arg1: memref<8x128xf32, #tpu.memory_space<vmem>>, %arg2: memref<128x128xf32, #tpu.memory_space<vmem>>, %arg3: memref<8x128xf32, #tpu.memory_space<vmem>>) attributes {dimension_semantics = [#tpu.dimension_semantics<arbitrary>], iteration_bounds = array<i64: 2>, scalar_prefetch = 0 : i64, scratch_operands = 0 : i64, tpu.core_type = #tpu.core_type<tc>, window_params = [{transform_indices = @transform_0, window_bounds = array<i64: 8, 128>}, {pipeline_mode = #tpu.pipeline_mode<synchronous>, transform_indices = @transform_1, window_bounds = array<i64: 128, 128>}, {pipeline_mode = #tpu.pipeline_mode<synchronous>, transform_indices = @transform_2, window_bounds = array<i64: 8, 128>}]} {
    %c0_i32 = arith.constant 0 : i32
    %0 = arith.cmpi eq, %arg0, %c0_i32 : i32
    %1 = arith.extui %0 : i1 to i32
    %c0_i32_0 = arith.constant 0 : i32
    %2 = arith.cmpi ne, %1, %c0_i32_0 : i32
    scf.if %2 {
      %cst_11 = arith.constant 0.000000e+00 : f32
      %13 = vector.broadcast %cst_11 : f32 to vector<128x128xf32>
      %c0_12 = arith.constant 0 : index
      %c0_13 = arith.constant 0 : index
      %14 = vector.load %arg2[%c0_12, %c0_13] : memref<128x128xf32, #tpu.memory_space<vmem>>, vector<128x128xf32>
      tpu.vector_store %arg2[%c0_12, %c0_13], %13 {strides = array<i32>} : memref<128x128xf32, #tpu.memory_space<vmem>>, vector<128x128xf32>,
      %cst_14 = arith.constant 0.000000e+00 : f32
      %15 = vector.broadcast %cst_14 : f32 to vector<8x128xf32>
      %c0_15 = arith.constant 0 : index
      %c0_16 = arith.constant 0 : index
      %16 = vector.load %arg3[%c0_15, %c0_16] : memref<8x128xf32, #tpu.memory_space<vmem>>, vector<8x128xf32>
      tpu.vector_store %arg3[%c0_15, %c0_16], %15 {strides = array<i32>} : memref<8x128xf32, #tpu.memory_space<vmem>>, vector<8x128xf32>,
    } else {
    }
    %c0 = arith.constant 0 : index
    %c0_1 = arith.constant 0 : index
    %3 = vector.load %arg1[%c0, %c0_1] : memref<8x128xf32, #tpu.memory_space<vmem>>, vector<8x128xf32>
    %c0_2 = arith.constant 0 : index
    %c0_3 = arith.constant 0 : index
    %4 = vector.load %arg2[%c0_2, %c0_3] : memref<128x128xf32, #tpu.memory_space<vmem>>, vector<128x128xf32>
    %cst = arith.constant dense<0.000000e+00> : vector<128x128xf32>
    %5 = tpu.matmul %3, %3, %cst {dimension_numbers = #tpu.dot_dimension_numbers<[0], [0], [1], [1], [0, 1, 1, 1], [], []>} : vector<8x128xf32>, vector<8x128xf32>, vector<128x128xf32> -> vector<128x128xf32>
    %6 = arith.addf %4, %5 : vector<128x128xf32>
    %c0_4 = arith.constant 0 : index
    %c0_5 = arith.constant 0 : index
    %7 = vector.load %arg2[%c0_4, %c0_5] : memref<128x128xf32, #tpu.memory_space<vmem>>, vector<128x128xf32>
    tpu.vector_store %arg2[%c0_4, %c0_5], %6 {strides = array<i32>} : memref<128x128xf32, #tpu.memory_space<vmem>>, vector<128x128xf32>,
    %c0_6 = arith.constant 0 : index
    %c0_7 = arith.constant 0 : index
    %8 = vector.load %arg3[%c0_6, %c0_7] : memref<8x128xf32, #tpu.memory_space<vmem>>, vector<1x128xf32>
    %cst_8 = arith.constant dense<0.000000e+00> : vector<128xf32>
    %9 = vector.multi_reduction <add>, %3, %cst_8 [0] : vector<8x128xf32> to vector<128xf32>
    %10 = vector.shape_cast %9 : vector<128xf32> to vector<1x128xf32>
    %11 = arith.addf %8, %10 : vector<1x128xf32>
    %c0_9 = arith.constant 0 : index
    %c0_10 = arith.constant 0 : index
    %12 = vector.load %arg3[%c0_9, %c0_10] : memref<8x128xf32, #tpu.memory_space<vmem>>, vector<1x128xf32>
    tpu.vector_store %arg3[%c0_9, %c0_10], %11 {strides = array<i32>} : memref<8x128xf32, #tpu.memory_space<vmem>>, vector<1x128xf32>,
    return
  }
  func.func @transform_0(%arg0: i32) -> (i32, i32) {
    %c0_i32 = arith.constant 0 : i32
    %c0_i32_0 = arith.constant 0 : i32
    return %arg0, %c0_i32 : i32, i32
  }
  func.func @transform_1(%arg0: i32) -> (i32, i32) {
    %c0_i32 = arith.constant 0 : i32
    %c0_i32_0 = arith.constant 0 : i32
    %c0_i32_1 = arith.constant 0 : i32
    return %c0_i32, %c0_i32_0 : i32, i32
  }
  func.func @transform_2(%arg0: i32) -> (i32, i32) {
    %c0_i32 = arith.constant 0 : i32
    %c0_i32_0 = arith.constant 0 : i32
    %c0_i32_1 = arith.constant 0 : i32
    return %c0_i32, %c0_i32_0 : i32, i32
  }
}

</mosaic_0001>

<bundles_post_ra>
// kernel: tpu_custom_call.1
= control target key start
LH: loop header
LB: loop body
LE: loop exit
PB: predicated region body
PF: predicated region fallthrough
CT: control target
= control target key end

     0   :  { %8 = vsyncpa [#allocation3], 0  ;;  %s975_s0 = inlined_call_operand.hbm [shape: f32[16,128], index: 0, kind: input, shape index: {}]   ;;  %s976_s1 = inlined_call_operand.hbm [shape: f32[128,128], index: 1, kind: output, shape index: {0}]   ;;  %s977_s2 = inlined_call_operand.hbm [shape: f32[8,128], index: 2, kind: output, shape index: {1}]  }
   0x1   :  { %10 = vsyncpa [#allocation3 + $0x1], 0 }
   0x2   :  { %11 = vsyncpa [#allocation4], 0 }
   0x3   :  { %12 = vsyncpa [#allocation7], 0  ;;  %s811_s9 = smov 0   ;;  %s813_s10 = smov 0  }
   0x4   :  { %s815_s11 = smov 0   ;;  %s817_s12 = smov 0  }
   0x5 LB: > { %s830_s13 = sadd.s32 4294967295, %s788_s12   ;;  %s833_s14 = sadd.s32 1, %s788_s12   ;;  %s788_s12 = sphi %s817_s12, %s985_s12   ;;  %s784_s11 = sphi %s815_s11, %s984_s11   ;;  %s780_s10 = sphi %s813_s10, %s983_s10   ;;  %s776_s9 = sphi %s811_s9, %s982_s9  }
   0x6   : > { %s22_s15 = ssub.s32 %s788_s12, %s833_s14  ;;  %s25_s16 = sadd.s32 1, %s784_s11 }
   0x7   : > { %p23_p0 = scmp.eq.s32.totalorder %s22_s15, 0  ;;  %p32_p1 = scmp.ne.s32.totalorder %s784_s11, %s780_s10 }
   0x8   : > { %p33_p2 = scmp.eq.s32.totalorder %s788_s12, 0  ;;  %p38_p3 = scmp.ne.s32.totalorder %s780_s10, %s776_s9 }
   0x9   : > { %s843_s17 = scalar_select %p23_p0, %s784_s11, %s25_s16  }
   0xa   : > { %p34_p4 = por %p33_p2, %p32_p1  ;;  %p39_p5 = scmp.eq.s32.totalorder %s830_s13, 0 }
   0xb   : > { %p621_p6 = scmp.lt.s32.totalorder %s788_s12, 2  ;;  %s104_s19 = sand.u32 1, %s784_s11  }
   0xc   : > { %p847_p7 = por %p39_p5, %p38_p3  ;;  %s535_s20 = sshll.u32 %s104_s19, 3 }
   0xd   : > { %s536_s21 = sshll.u32 %s788_s12, 7  ;;  %s108_s25 = scalar_lea.vmem [#allocation2], %s535_s20 }
   0xe   : > { %s856_s24 = scalar_lea.hbm %s975_s0, %s536_s21  ;;  %s115_s26 = sshll.u32 %s108_s25, 4  ;;  %s858_s26 = int_to_ptr.vmem [resolvable:$true] %s115_s26 }
   0xf   : > { %p860_p8 = pnand %p621_p6, %p34_p4  ;;  %s105_s28 = scalar_lea.sflag [#allocation3], %s104_s19 }
  0x10   : > { %s664_s29 = scalar_lea.hbm %s856_s24, 128  ;;  %s669_s4 = scalar_lea.hbm %s975_s0, 256 }
  0x11   : > { %p665_p11 = scmp.ne.s32.totalorder %s856_s24, %s664_s29  ;;  %p666_p12 = pneg %p860_p8 }
  0x12   : > { %p670_p1 = scmp.lt.u32.totalorder %s856_s24, %s975_s0  ;;  %p671_p2 = scmp.lt.u32.totalorder %s669_s4, %s664_s29 }
  0x13   : > { %p667_p13 = pnand %p666_p12, %p665_p11  ;;  %p673_p4 = scmp.lt.u32.totalorder %s664_s29, %s856_s24 }
  0x14   : > { %p672_p3 = por %p671_p2, %p670_p1 }
  0x15   : > { %p668_p0 = pneg %p667_p13 }
  0x16   : > { %p674_p5 = por %p673_p4, %p672_p3 }
  0x18   : > { %p675_p6 = pnand %p674_p5, %p668_p0 }
  0x1a   : > { %678 = shalt.err (!%p675_p6)
}
  0x1b   : > { %s679_s7 = scalar_lea.vmem %s858_s26, 128  ;;  %s790_s8 = smov [#allocation2]  }
  0x1c   : > { %p680_p11 = scmp.ne.s32.totalorder %s858_s26, %s679_s7  ;;  %s684_s9 = sshll.u32 %s790_s8, 4  ;;  %s685_s9 = int_to_ptr.vmem [resolvable:$false] %s684_s9 }
  0x1d   : > { %s686_s15 = scalar_lea.vmem %s685_s9, 256  ;;  %p687_p10 = scmp.lt.s32.totalorder %s858_s26, %s685_s9 }
  0x1e   : > { %p682_p13 = pnand %p680_p11, %p666_p12  ;;  %p688_p1 = scmp.lt.s32.totalorder %s686_s15, %s679_s7 }
  0x20   : > { %p683_p9 = pneg %p682_p13  ;;  %p689_p2 = por %p688_p1, %p687_p10 }
  0x22   : > { %p690_p3 = pnand %p689_p2, %p683_p9 }
  0x24   : > { %693 = shalt.err (!%p690_p3)
}
  0x25   : > { %620 = dma.hbm_to_vmem [thread:$0]  (!%p860_p8), %s856_s24, 128, %s858_s26, %s105_s28  }
  0x26   : > { %p980_p0 = scmp.lt.s32.totalorder %s788_s12, 3  ;;  %p981_p4 = scmp.ge.s32.totalorder %s788_s12, 1 }
  0x28   : > { %p121_p12 = pnand %p981_p4, %p980_p0 }
  0x29   : > { %s126_s16 = sand.u32 (!%p121_p12), 1, %s780_s10  }
  0x2a   : > { %124 = sbr.rel (%p121_p12) target bundleno = 484 (0x1e4), region = 24  ;;  %s538_s19 = sshll.u32 (!%p121_p12), %s126_s16, 3 }
  0x2b   : > { %s127_s20 = scalar_lea.sflag (!%p121_p12), [#allocation3], %s126_s16  ;;  %s130_s21 = scalar_lea.vmem (!%p121_p12), [#allocation2], %s538_s19 }
  0x31   : > { %763 = dma.done.wait (%p847_p7), %s127_s20, 128  }
  0x32   : > { %765 = vsyncadd (%p847_p7), %s127_s20, 4294967168  ;;  %p539_p9 = scmp.ne.s32.totalorder %s830_s13, 0 }
  0x33   : > { %v791_v0 = vmov (!%p539_p9), 0.0  }
  0x34   : > { %149 = sbr.rel (%p539_p9) target bundleno = 61 (0x3d), region = 32  ;;  %150 = vst [vmem:[#allocation5] sm:$0xff] (!%p539_p9), %v791_v0  ;;  %151 = vst [vmem:[#allocation5 + $0x8] sm:$0xff] (!%p539_p9), %v791_v0 }
  0x35   : > { %152 = vst [vmem:[#allocation5 + $0x10] sm:$0xff] (!%p539_p9), %v791_v0  ;;  %153 = vst [vmem:[#allocation5 + $0x18] sm:$0xff] (!%p539_p9), %v791_v0 }
  0x36   : > { %154 = vst [vmem:[#allocation5 + $0x20] sm:$0xff] (!%p539_p9), %v791_v0  ;;  %155 = vst [vmem:[#allocation5 + $0x28] sm:$0xff] (!%p539_p9), %v791_v0 }
  0x37   : > { %156 = vst [vmem:[#allocation5 + $0x30] sm:$0xff] (!%p539_p9), %v791_v0  ;;  %157 = vst [vmem:[#allocation5 + $0x38] sm:$0xff] (!%p539_p9), %v791_v0 }
  0x38   : > { %158 = vst [vmem:[#allocation5 + $0x40] sm:$0xff] (!%p539_p9), %v791_v0  ;;  %159 = vst [vmem:[#allocation5 + $0x48] sm:$0xff] (!%p539_p9), %v791_v0 }
  0x39   : > { %160 = vst [vmem:[#allocation5 + $0x50] sm:$0xff] (!%p539_p9), %v791_v0  ;;  %161 = vst [vmem:[#allocation5 + $0x58] sm:$0xff] (!%p539_p9), %v791_v0 }
  0x3a   : > { %162 = vst [vmem:[#allocation5 + $0x60] sm:$0xff] (!%p539_p9), %v791_v0  ;;  %163 = vst [vmem:[#allocation5 + $0x68] sm:$0xff] (!%p539_p9), %v791_v0 }
  0x3b   : > { %164 = vst [vmem:[#allocation5 + $0x70] sm:$0xff] %v791_v0  ;;  %165 = vst [vmem:[#allocation5 + $0x78] sm:$0xff] %v791_v0 }
  0x3c   : > { %166 = vst [vmem:[#allocation6] sm:$0xff] %v791_v0 }
  0x3d PF: > { %v167_v1 = vld [vmem:[%s130_s21] sm:$0xff]  ;;  %vm216_vm0 = vcmask 64512   ;;  %p622_p7 = scmp.eq.s32.totalorder %s830_s13, 1  ;;  %s792_s12 = smov [#allocation6]  }
  0x3e   : > { %184 = vxpose.xlu0.b32.start.end [1/1] (short) %v167_v1, 128  ;;  %579 = vmatprep.subr.mxu0 %v167_v1  ;;  %v443_v18 = vrot.slane %v167_v1, 4  ;;  %s471_s18 = sshll.u32 %s792_s12, 4  ;;  %s472_s18 = int_to_ptr.vmem [resolvable:$true] %s471_s18 }
  0x3f   : > { %580 = vmatpush3.msra.mxu0 %v167_v1  ;;  %605 = vmatprep.subr.mxu1 %v167_v1  ;;  %s694_s22 = scalar_lea.vmem %s472_s18, 128  ;;  %p701_p6 = scmp.lt.s32.totalorder %s472_s18, %s472_s18 }
  0x40   : > { %606 = vmatpush3.msra.mxu1 %v167_v1  ;;  %v444_v19 = vadd.f32 %v443_v18, %v167_v1  ;;  %p695_p8 = scmp.ne.s32.totalorder %s472_s18, %s694_s22  ;;  %p702_p11 = scmp.lt.s32.totalorder %s694_s22, %s694_s22 }
  0x42   : > { %v445_v20 = vrot.slane %v444_v19, 2  ;;  %p696_p10 = pnand %p695_p8, %p622_p7  ;;  %p703_p13 = por %p702_p11, %p701_p6 }
  0x43   : > { %v442_v24 = vld [vmem:[#allocation6] sm:$0x1] }
  0x44   : > { %v446_v21 = vadd.f32 %v445_v20, %v444_v19  ;;  %p697_p5 = pneg %p696_p10 }
  0x46   : > { %v447_v22 = vrot.slane %v446_v21, 1  ;;  %p704_p1 = pnand %p703_p13, %p697_p5 }
  0x48   : > { %v448_v23 = vadd.f32 %v447_v22, %v446_v21 }
  0x4a   : > { %v449_v25 = vadd.f32 %v448_v23, %v442_v24 }
  0x4c   : > { %450 = vst [vmem:[#allocation6] sm:$0x1] %v449_v25 }
  0xbe   : > { %v200_v2 = vpop.trf.xlu0 }
  0xbf   : > { %581 = vmatprep.mubr.msk.f32.mxu0 %vm216_vm0, %v200_v2 }
  0xc2   : > { %v201_v3 = vpop.trf.xlu0 }
  0xc3   : > { %582 = vmatmul.mubr.msk.f32.vlgmr.msra.gmra.mrb[0].mxu0 %vm216_vm0, %v201_v3 }
  0xc6   : > { %v202_v4 = vpop.trf.xlu0 }
  0xc7   : > { %584 = vmatprep.mubr.msk.f32.mxu0 %vm216_vm0, %v202_v4 }
  0xca   : > { %v203_v5 = vpop.trf.xlu0 }
  0xcb   : > { %585 = vmatmul.mubr.msk.f32.gmra.mrb[2].mxu0 %vm216_vm0, %v203_v5 }
  0xce   : > { %v204_v6 = vpop.trf.xlu0 }
  0xcf   : > { %587 = vmatprep.mubr.msk.f32.mxu0 %vm216_vm0, %v204_v6 }
  0xd2   : > { %v205_v7 = vpop.trf.xlu0 }
  0xd3   : > { %588 = vmatmul.mubr.msk.f32.gmra.mrb[4].mxu0 %vm216_vm0, %v205_v7 }
  0xd6   : > { %v206_v8 = vpop.trf.xlu0 }
  0xd7   : > { %590 = vmatprep.mubr.msk.f32.mxu0 %vm216_vm0, %v206_v8 }
  0xda   : > { %v207_v9 = vpop.trf.xlu0 }
  0xdb   : > { %591 = vmatmul.mubr.msk.f32.gmra.mrb[6].mxu0 %vm216_vm0, %v207_v9 }
  0xde   : > { %v208_v10 = vpop.trf.xlu0 }
  0xdf   : > { %593 = vmatprep.mubr.msk.f32.mxu1 %vm216_vm0, %v208_v10 }
  0xe2   : > { %v209_v11 = vpop.trf.xlu0 }
  0xe3   : > { %594 = vmatmul.mubr.msk.f32.vlgmr.msra.gmra.mrb[0].mxu1 %vm216_vm0, %v209_v11 }
  0xe6   : > { %v210_v12 = vpop.trf.xlu0 }
  0xe7   : > { %596 = vmatprep.mubr.msk.f32.mxu1 %vm216_vm0, %v210_v12 }
  0xea   : > { %v211_v13 = vpop.trf.xlu0 }
  0xeb   : > { %597 = vmatmul.mubr.msk.f32.gmra.mrb[2].mxu1 %vm216_vm0, %v211_v13 }
  0xee   : > { %v212_v14 = vpop.trf.xlu0 }
  0xef   : > { %599 = vmatprep.mubr.msk.f32.mxu1 %vm216_vm0, %v212_v14 }
  0xf2   : > { %v213_v15 = vpop.trf.xlu0 }
  0xf3   : > { %600 = vmatmul.mubr.msk.f32.gmra.mrb[4].mxu1 %vm216_vm0, %v213_v15 }
  0xf6   : > { %v214_v16 = vpop.trf.xlu0 }
  0xf7   : > { %602 = vmatprep.mubr.msk.f32.mxu1 %vm216_vm0, %v214_v16 }
  0xfa   : > { %v215_v17 = vpop.trf.xlu0 }
  0xfb   : > { %603 = vmatmul.mubr.msk.f32.gmra.mrb[6].mxu1 %vm216_vm0, %v215_v17 }
  0xfc   : > { %707 = shalt.err (!%p704_p1)
}
  0xfd   : > { %s708_s25 = scalar_lea.hbm %s977_s2, 128 }
  0xfe   : > { %p709_p2 = scmp.ne.s32.totalorder %s977_s2, %s708_s25  ;;  %p714_p4 = scmp.lt.u32.totalorder %s708_s25, %s977_s2 }
 0x100   : > { %p710_p3 = pnand %p709_p2, %p622_p7 }
 0x102   : > { %p711_p0 = pneg %p710_p3 }
 0x104   : > { %p716_p12 = pnand %p714_p4, %p711_p0 }
 0x106   : > { %719 = shalt.err (!%p716_p12)
}
 0x107   : > { %612 = dma.vmem_to_hbm [thread:$0]  (%p622_p7), %s472_s18, 128, %s977_s2, [#allocation7]   ;;  %v169_v26 = vld [vmem:[#allocation5 + $0x8] sm:$0xff]  ;;  %v168_v27 = vld [vmem:[#allocation5] sm:$0xff]  ;;  %v171_v32 = vld [vmem:[#allocation5 + $0x18] sm:$0xff] }
 0x108   : > { %v170_v33 = vld [vmem:[#allocation5 + $0x10] sm:$0xff]  ;;  %v173_v38 = vld [vmem:[#allocation5 + $0x28] sm:$0xff]  ;;  %v172_v39 = vld [vmem:[#allocation5 + $0x20] sm:$0xff]  ;;  %s793_s4 = smov [#allocation5]  }
 0x109   : > { %v175_v44 = vld [vmem:[#allocation5 + $0x38] sm:$0xff]  ;;  %v174_v45 = vld [vmem:[#allocation5 + $0x30] sm:$0xff]  ;;  %v177_v50 = vld [vmem:[#allocation5 + $0x48] sm:$0xff]  ;;  %s457_s5 = sshll.u32 %s793_s4, 4  ;;  %s458_s5 = int_to_ptr.vmem [resolvable:$true] %s457_s5 }
 0x10a   : > { %v176_v51 = vld [vmem:[#allocation5 + $0x40] sm:$0xff]  ;;  %v179_v56 = vld [vmem:[#allocation5 + $0x58] sm:$0xff]  ;;  %v178_v57 = vld [vmem:[#allocation5 + $0x50] sm:$0xff]  ;;  %s720_s6 = scalar_lea.vmem %s458_s5, 2048  ;;  %p727_p5 = scmp.lt.s32.totalorder %s458_s5, %s458_s5 }
 0x10b   : > { %v181_v62 = vld [vmem:[#allocation5 + $0x68] sm:$0xff]  ;;  %v180_v63 = vld [vmem:[#allocation5 + $0x60] sm:$0xff]  ;;  %v183_v4 = vld [vmem:[#allocation5 + $0x78] sm:$0xff]  ;;  %p721_p9 = scmp.ne.s32.totalorder %s458_s5, %s720_s6  ;;  %p728_p6 = scmp.lt.s32.totalorder %s720_s6, %s720_s6 }
 0x10c   : > { %v182_v5 = vld [vmem:[#allocation5 + $0x70] sm:$0xff] }
 0x10d   : > { %p722_p8 = pnand %p721_p9, %p622_p7  ;;  %p729_p11 = por %p728_p6, %p727_p5 }
 0x10f   : > { %p723_p10 = pneg %p722_p8 }
 0x111   : > { %p730_p13 = pnand %p729_p11, %p723_p10 }
 0x196   : > { %v583_v28 = vpop.f32.mrb[0].mxu0 }
 0x197   : > { %v411_v29 = vadd.f32 %v583_v28, %v169_v26  ;;  %v331_v30 = vpop.f32.mrb[1].mxu0 }
 0x198   : > { %v410_v31 = vadd.f32 %v331_v30, %v168_v27 }
 0x199   : > { %427 = vst [vmem:[#allocation5 + $0x8] sm:$0xff] %v411_v29 }
 0x19a   : > { %426 = vst [vmem:[#allocation5] sm:$0xff] %v410_v31 }
 0x19e   : > { %v586_v34 = vpop.f32.mrb[2].mxu0 }
 0x19f   : > { %v413_v35 = vadd.f32 %v586_v34, %v171_v32  ;;  %v341_v36 = vpop.f32.mrb[3].mxu0 }
 0x1a0   : > { %v412_v37 = vadd.f32 %v341_v36, %v170_v33 }
 0x1a1   : > { %429 = vst [vmem:[#allocation5 + $0x18] sm:$0xff] %v413_v35 }
 0x1a2   : > { %428 = vst [vmem:[#allocation5 + $0x10] sm:$0xff] %v412_v37 }
 0x1a6   : > { %v589_v40 = vpop.f32.mrb[4].mxu0 }
 0x1a7   : > { %v415_v41 = vadd.f32 %v589_v40, %v173_v38  ;;  %v351_v42 = vpop.f32.mrb[5].mxu0 }
 0x1a8   : > { %v414_v43 = vadd.f32 %v351_v42, %v172_v39 }
 0x1a9   : > { %431 = vst [vmem:[#allocation5 + $0x28] sm:$0xff] %v415_v41 }
 0x1aa   : > { %430 = vst [vmem:[#allocation5 + $0x20] sm:$0xff] %v414_v43 }
 0x1ae   : > { %v592_v46 = vpop.f32.mrb[6].mxu0 }
 0x1af   : > { %v417_v47 = vadd.f32 %v592_v46, %v175_v44  ;;  %v361_v48 = vpop.f32.mrb[7].mxu0 }
 0x1b0   : > { %v416_v49 = vadd.f32 %v361_v48, %v174_v45 }
 0x1b1   : > { %433 = vst [vmem:[#allocation5 + $0x38] sm:$0xff] %v417_v47 }
 0x1b2   : > { %432 = vst [vmem:[#allocation5 + $0x30] sm:$0xff] %v416_v49 }
 0x1b6   : > { %v595_v52 = vpop.f32.mrb[0].mxu1 }
 0x1b7   : > { %v419_v53 = vadd.f32 %v595_v52, %v177_v50  ;;  %v371_v54 = vpop.f32.mrb[1].mxu1 }
 0x1b8   : > { %v418_v55 = vadd.f32 %v371_v54, %v176_v51 }
 0x1b9   : > { %435 = vst [vmem:[#allocation5 + $0x48] sm:$0xff] %v419_v53 }
 0x1ba   : > { %434 = vst [vmem:[#allocation5 + $0x40] sm:$0xff] %v418_v55 }
 0x1be   : > { %v598_v58 = vpop.f32.mrb[2].mxu1 }
 0x1bf   : > { %v421_v59 = vadd.f32 %v598_v58, %v179_v56  ;;  %v381_v60 = vpop.f32.mrb[3].mxu1 }
 0x1c0   : > { %v420_v61 = vadd.f32 %v381_v60, %v178_v57 }
 0x1c1   : > { %437 = vst [vmem:[#allocation5 + $0x58] sm:$0xff] %v421_v59 }
 0x1c2   : > { %436 = vst [vmem:[#allocation5 + $0x50] sm:$0xff] %v420_v61 }
 0x1c6   : > { %v601_v0 = vpop.f32.mrb[4].mxu1 }
 0x1c7   : > { %v423_v1 = vadd.f32 %v601_v0, %v181_v62  ;;  %v391_v2 = vpop.f32.mrb[5].mxu1 }
 0x1c8   : > { %v422_v3 = vadd.f32 %v391_v2, %v180_v63 }
 0x1c9   : > { %439 = vst [vmem:[#allocation5 + $0x68] sm:$0xff] %v423_v1 }
 0x1ca   : > { %438 = vst [vmem:[#allocation5 + $0x60] sm:$0xff] %v422_v3 }
 0x1ce   : > { %v604_v6 = vpop.f32.mrb[6].mxu1 }
 0x1cf   : > { %v425_v7 = vadd.f32 %v604_v6, %v183_v4  ;;  %v401_v8 = vpop.f32.mrb[7].mxu1 }
 0x1d0   : > { %v424_v9 = vadd.f32 %v401_v8, %v182_v5 }
 0x1d1   : > { %441 = vst [vmem:[#allocation5 + $0x78] sm:$0xff] %v425_v7 }
 0x1d2   : > { %440 = vst [vmem:[#allocation5 + $0x70] sm:$0xff] %v424_v9 }
 0x1d3   : > { %733 = shalt.err (!%p730_p13)
}
 0x1d4   : > { %s734_s9 = scalar_lea.hbm %s976_s1, 2048 }
 0x1d5   : > { %p735_p1 = scmp.ne.s32.totalorder %s976_s1, %s734_s9  ;;  %p740_p0 = scmp.lt.u32.totalorder %s734_s9, %s976_s1 }
 0x1d7   : > { %p736_p2 = pnand %p735_p1, %p622_p7 }
 0x1d9   : > { %p737_p3 = pneg %p736_p2 }
 0x1db   : > { %p742_p4 = pnand %p740_p0, %p737_p3 }
 0x1dd   : > { %745 = shalt.err (!%p742_p4)
}
 0x1de   : > { %s794_s21 = smov 128   ;;  %s795_s12 = smov 8  }
 0x1df   : > { %610 = dma.vmem_to_hbm [thread:$0]  (%p622_p7), %s458_s5, 2048, %s976_s1, [#allocation4], %s794_s21, %s794_s21, %s795_s12  }
 0x1e0   : > { %767 = dma.done.wait (%p622_p7), [#allocation4], 2048  }
 0x1e1   : > { %769 = vsyncadd (%p622_p7), [#allocation4], 4294965248 }
 0x1e2   : > { %771 = dma.done.wait (%p622_p7), [#allocation7], 128  }
 0x1e3   : > { %773 = vsyncadd (%p622_p7), [#allocation7], 4294967168 }
 0x1e4 PF: > { %p15_p12 = scmp.ge.s32.totalorder %s833_s14, 4   ;;  %s982_s9 = smov %s780_s10 }
 0x1e5   : > { %s983_s10 = smov %s784_s11  ;;  %s984_s11 = smov %s843_s17 }
 0x1e6   : > { %s985_s12 = smov %s833_s14  ;;  %17 = sbr.rel (!%p15_p12) target bundleno = 5 (0x5), region = 73 }
 0x1ed   :  { %488 = vsyncpa [#allocation3], 1 }
 0x1ee   :  { %490 = vsyncpa [#allocation3 + $0x1], 1 }
 0x1ef   :  { %491 = vsyncpa [#allocation4], 1 }
 0x1f0   :  { %493 = vsyncpa [#allocation4 + $0x1], 1 }
 0x1f1   :  { %494 = vsyncpa [#allocation7], 1 }

</bundles_post_ra>
